<compile_context>
chip_gen: v7x
topology: tpu7x:2x2x1
jax: 0.10.0
libtpu: 0.0.40
codegen_flags: <defaults>
</compile_context>

<pallas_src>
import functools

import jax
import jax.numpy as jnp
from jax.experimental import pallas as pl
from jax.experimental.pallas import tpu as pltpu

_LEAKY_SLOPE = 0.2


def _vmem_budget_bytes():
    """~75% of physical VMEM (48 MiB on v7x, 96 MiB on v5e/v6e); safe fallback 48 MiB."""
    try:
        cap = int(pltpu.get_tpu_info().vmem_capacity_bytes)
    except Exception:
        cap = 64 * 1024 * 1024
    return (cap * 3) // 4


def _choose_row_tile(n, heads, out_dim, vmem_budget):
    """Largest TM (multiple of 32, >=2 tiles when possible) fitting the VMEM budget.

    Budget model for the attention call (the projection call is strictly smaller):
      resident (single-buffered): h [N, H*F] bf16 + src scores [H, N] f32
      per step (double-buffered): adj [TM, N] int8 + attn [H, TM, N] bf16
                                  + dst [TM, H] f32 + out [TM, F] f32
    """
    hf = heads * out_dim
    if n <= 32:
        return n  # can't split below the int8 (32, 128) sublane tile
    resident = n * hf * 2 + heads * n * 4
    best = 32
    tm = 32
    cap = min(512, n)
    while tm <= cap:
        per_step = 2 * (tm * n * 1 + heads * tm * n * 2 + tm * heads * 4 + tm * out_dim * 4)
        if resident + per_step <= vmem_budget and pl.cdiv(n, tm) >= 2:
            best = tm
        tm += 32
    return best


def _project_kernel(x_ref, w_ref, hs_ref):
    """Fused projection + per-node attention scores: one bf16 MXU matmul, f32 acc."""
    hs_ref[...] = jnp.dot(x_ref[...], w_ref[...],
                          preferred_element_type=jnp.float32).astype(hs_ref.dtype)


def _attention_kernel(h_ref, src_ref, dst_ref, adj_ref, out_ref, attn_ref, *,
                      heads, out_dim, leaky_slope, guard_isolated):
    """One tile of TM target rows: masked softmax over incoming edges + aggregation."""
    h_all = h_ref[...]                                        # [N, H*F] bf16 (all sources)
    edge_mask = adj_ref[...] > 0                              # [TM, N]  (int8 mask)
    neg_inf = jnp.float32(-1e30)
    if guard_isolated:
        # Only compiled when self_loop=False: rows with zero in-edges attend to nothing.
        has_edge = jnp.any(edge_mask, axis=-1, keepdims=True)  # [TM, 1]

    acc = jnp.zeros(out_ref.shape, jnp.float32)               # local accumulator (no RMW)

    # heads is tiny and static -> unrolled Python loop.
    for hd in range(heads):
        # e[i, j] = dst_score(target i) + src_score(source j)
        dst_col = dst_ref[:, hd:hd + 1]                       # [TM, 1] f32
        src_row = src_ref[hd:hd + 1, :]                       # [1, N]  f32
        e = dst_col + src_row                                 # [TM, N] f32
        e = jnp.maximum(e, leaky_slope * e)                   # LeakyReLU(0.2), 0<slope<1
        e = jnp.where(edge_mask, e, neg_inf)                  # mask non-edges

        # Masked softmax over incoming edges (columns).  Self loops guarantee >=1 edge
        # per row, and exp(-1e30 - m) underflows to exactly 0, so no second mask needed.
        m = jnp.max(e, axis=-1, keepdims=True)
        p = jnp.exp(e - m)
        denom = jnp.sum(p, axis=-1, keepdims=True)
        alpha = p * pl.reciprocal(denom, approx=True)         # [TM, N] f32
        if guard_isolated:
            alpha = jnp.where(has_edge, alpha, 0.0)

        alpha_bf = alpha.astype(jnp.bfloat16)                 # single f32->bf16 convert
        attn_ref[hd, :, :] = alpha_bf                         # bf16 writeback

        # Message aggregation on the MXU (bf16 operands, f32 accumulation).
        hh = h_all[:, hd * out_dim:(hd + 1) * out_dim]        # [N, F] bf16
        acc = acc + jnp.dot(alpha_bf, hh, preferred_element_type=jnp.float32)

    # concat=False -> average over heads; single store of the output block.
    out_ref[...] = acc * jnp.float32(1.0 / heads)


def gat_layer(x, w, att_src, att_dst, adj, *, heads, out_dim, row_tile=None,
              guard_isolated=False):
    n, in_dim = x.shape
    hf = heads * out_dim
    proj_cols = hf + 2 * heads

    # Block-diagonal attention-vector matrix A [H*F, 2H] folded into the projection
    # weight once per layer (tiny, built outside the kernels).
    att_mat = jnp.zeros((hf, 2 * heads), jnp.float32)
    for hd in range(heads):
        att_mat = att_mat.at[hd * out_dim:(hd + 1) * out_dim, hd].set(att_src[hd])
        att_mat = att_mat.at[hd * out_dim:(hd + 1) * out_dim, heads + hd].set(att_dst[hd])
    w_aug = jnp.concatenate([w, jnp.dot(w, att_mat)], axis=1).astype(jnp.bfloat16)
    x_bf = x.astype(jnp.bfloat16)       # halve HBM read traffic of the projection call

    vmem_budget = _vmem_budget_bytes()
    if row_tile is None:
        tm = _choose_row_tile(n, heads, out_dim, vmem_budget)
    else:
        tm = n if row_tile >= n else max(32, (row_tile // 32) * 32)
    n_tiles = pl.cdiv(n, tm)

    cparams = pltpu.CompilerParams(
        dimension_semantics=("parallel",),   # row tiles are independent -> megacore on v7x
        vmem_limit_bytes=vmem_budget,
    )

    # ---- 1) fused projection + per-node scores ----
    proj = pl.pallas_call(
        _project_kernel,
        out_shape=jax.ShapeDtypeStruct((n, proj_cols), jnp.bfloat16),
        grid=(n_tiles,),
        in_specs=[
            pl.BlockSpec((tm, in_dim), lambda i: (i, 0)),             # x rows (bf16)
            pl.BlockSpec((in_dim, proj_cols), lambda i: (0, 0),
                         pipeline_mode=pl.Buffered(1)),               # W_aug (resident)
        ],
        out_specs=pl.BlockSpec((tm, proj_cols), lambda i: (i, 0)),
        compiler_params=cparams,
    )(x_bf, w_aug)

    # Tiny layout fixups (once per layer, outside the row-tiled hot loop).
    h = proj[:, :hf]                                   # [N, H*F] bf16 projected features
    scores = proj[:, hf:].astype(jnp.float32)          # [N, 2H]  f32
    src_scores = scores[:, :heads].T                   # [H, N]   source score of every node
    dst_scores = scores[:, heads:]                     # [N, H]   target score of every node

    # ---- 2) row-tiled attention + aggregation ----
    kernel = functools.partial(_attention_kernel, heads=heads, out_dim=out_dim,
                               leaky_slope=_LEAKY_SLOPE, guard_isolated=guard_isolated)
    out, attn = pl.pallas_call(
        kernel,
        out_shape=(
            jax.ShapeDtypeStruct((n, out_dim), jnp.float32),
            jax.ShapeDtypeStruct((heads, n, n), jnp.bfloat16),
        ),
        grid=(n_tiles,),
        in_specs=[
            pl.BlockSpec((n, hf), lambda i: (0, 0),
                         pipeline_mode=pl.Buffered(1)),               # h (all rows, resident)
            pl.BlockSpec((heads, n), lambda i: (0, 0),
                         pipeline_mode=pl.Buffered(1)),               # src scores (resident)
            pl.BlockSpec((tm, heads), lambda i: (i, 0)),              # dst scores (tile rows)
            pl.BlockSpec((tm, n), lambda i: (i, 0)),                  # adjacency rows (int8)
        ],
        out_specs=(
            pl.BlockSpec((tm, out_dim), lambda i: (i, 0)),
            pl.BlockSpec((heads, tm, n), lambda i: (0, i, 0)),
        ),
        compiler_params=cparams,
    )(h, src_scores, dst_scores, adj)
    return out, attn


def amatrix_forward(x, edge_index, layer_params, *, heads, out_dim,
                    self_loop=True, row_tile=None):
    """Mirrors Amatrix.forward: run each conv, stack [x, x1, ...] on dim=1, mean."""
    n = x.shape[0]
    src, dst = edge_index[0], edge_index[1]
    # Dense int8 adjacency mask (1 byte/edge-slot -> ~1/3 less attention-kernel input
    # traffic vs bf16); adj[i, j] = 1 iff edge j -> i.
    adj = jnp.zeros((n, n), jnp.int8).at[dst, src].set(1)
    if self_loop:
        adj = adj.at[jnp.arange(n), jnp.arange(n)].set(1)

    feats = [x]
    attns = []
    h = x
    for (w, a_src, a_dst) in layer_params:
        h, attn = gat_layer(h, w, a_src, a_dst, adj,
                            heads=heads, out_dim=out_dim, row_tile=row_tile,
                            guard_isolated=not self_loop)
        feats.append(h)
        attns.append(attn)

    feat = jnp.stack(feats, axis=1)          # [N, n_layer+1, F]
    out = jnp.mean(feat, axis=1)             # [N, F]
    return out, attns


if __name__ == "__main__":
    # Small deterministic example. in_dim must equal out_dim (Amatrix stacks the
    # input with layer outputs), matching how MultiCBR uses this module.
    N, IN_DIM, OUT_DIM, HEADS, N_LAYER, E = 64, 32, 32, 2, 2, 160

    key = jax.random.PRNGKey(0)
    k_x, k_e1, k_e2, *k_params = jax.random.split(key, 3 + 3 * N_LAYER)

    x = jax.random.normal(k_x, (N, IN_DIM), dtype=jnp.float32)
    edge_src = jax.random.randint(k_e1, (E,), 0, N)
    edge_dst = jax.random.randint(k_e2, (E,), 0, N)
    edge_index = jnp.stack([edge_src, edge_dst], axis=0)     # [2, E]

    layer_params = []
    for li in range(N_LAYER):
        kw, ks, kd = k_params[3 * li], k_params[3 * li + 1], k_params[3 * li + 2]
        w = jax.random.normal(kw, (IN_DIM, HEADS * OUT_DIM), dtype=jnp.float32) * 0.1
        a_src = jax.random.normal(ks, (HEADS, OUT_DIM), dtype=jnp.float32) * 0.1
        a_dst = jax.random.normal(kd, (HEADS, OUT_DIM), dtype=jnp.float32) * 0.1
        layer_params.append((w, a_src, a_dst))

    # row_tile=None -> analytic VMEM-budget tiling (N=64 -> TM=32 -> 2 row tiles,
    # exercising the multi-tile grid).
    out, attns = amatrix_forward(
        x, edge_index, layer_params, heads=HEADS, out_dim=OUT_DIM,
        self_loop=True, row_tile=None,
    )
    jax.block_until_ready(out)
    for a in attns:
        jax.block_until_ready(a)

    assert out.shape == (N, OUT_DIM)
    assert all(a.shape == (HEADS, N, N) for a in attns)
    print("KERNEL_OK")
</pallas_src>

<mosaic_0001>
module attributes {stable_mosaic.version = 11 : i64} {
  func.func @_project_kernel(%arg0: i32, %arg1: memref<32x32xbf16, #tpu.memory_space<vmem>>, %arg2: memref<32x68xbf16, #tpu.memory_space<vmem>>, %arg3: memref<32x68xbf16, #tpu.memory_space<vmem>>) attributes {dimension_semantics = [#tpu.dimension_semantics<parallel>], iteration_bounds = array<i64: 2>, scalar_prefetch = 0 : i64, scratch_operands = 0 : i64, tpu.core_type = #tpu.core_type<tc>, window_params = [{transform_indices = @transform_0, window_bounds = array<i64: 32, 32>}, {pipeline_mode = #tpu.pipeline_mode<synchronous>, transform_indices = @transform_1, window_bounds = array<i64: 32, 68>}, {transform_indices = @transform_2, window_bounds = array<i64: 32, 68>}]} {
    %c0 = arith.constant 0 : index
    %c0_0 = arith.constant 0 : index
    %0 = vector.load %arg1[%c0, %c0_0] : memref<32x32xbf16, #tpu.memory_space<vmem>>, vector<32x32xbf16>
    %c0_1 = arith.constant 0 : index
    %c0_2 = arith.constant 0 : index
    %1 = vector.load %arg2[%c0_1, %c0_2] : memref<32x68xbf16, #tpu.memory_space<vmem>>, vector<32x68xbf16>
    %cst = arith.constant dense<0.000000e+00> : vector<32x68xf32>
    %2 = tpu.matmul %0, %1, %cst {dimension_numbers = #tpu.dot_dimension_numbers<[1], [0], [0], [1], [0, 0, 1, 1], [], []>} : vector<32x32xbf16>, vector<32x68xbf16>, vector<32x68xf32> -> vector<32x68xf32>
    %3 = arith.truncf %2 : vector<32x68xf32> to vector<32x68xbf16>
    %c0_3 = arith.constant 0 : index
    %c0_4 = arith.constant 0 : index
    %4 = vector.load %arg3[%c0_3, %c0_4] : memref<32x68xbf16, #tpu.memory_space<vmem>>, vector<32x68xbf16>
    tpu.vector_store %arg3[%c0_3, %c0_4], %3 {strides = array<i32>} : memref<32x68xbf16, #tpu.memory_space<vmem>>, vector<32x68xbf16>,
    return
  }
  func.func @transform_0(%arg0: i32) -> (i32, i32) {
    %c0_i32 = arith.constant 0 : i32
    %c0_i32_0 = arith.constant 0 : i32
    return %arg0, %c0_i32 : i32, i32
  }
  func.func @transform_1(%arg0: i32) -> (i32, i32) {
    %c0_i32 = arith.constant 0 : i32
    %c0_i32_0 = arith.constant 0 : i32
    %c0_i32_1 = arith.constant 0 : i32
    return %c0_i32, %c0_i32_0 : i32, i32
  }
  func.func @transform_2(%arg0: i32) -> (i32, i32) {
    %c0_i32 = arith.constant 0 : i32
    %c0_i32_0 = arith.constant 0 : i32
    return %arg0, %c0_i32 : i32, i32
  }
}

</mosaic_0001>

<bundles_post_ra>
// kernel: tpu_custom_call.1
= control target key start
LH: loop header
LB: loop body
LE: loop exit
PB: predicated region body
PF: predicated region fallthrough
CT: control target
= control target key end

     0   :  { %7 = vsyncpa [#allocation3], 0  ;;  %s607_s0 = inlined_call_operand.vmem [shape: bf16[64,32], index: 0, kind: input, shape index: {}]   ;;  %s608_s1 = inlined_call_operand.vmem [shape: bf16[32,68], index: 1, kind: input, shape index: {}]   ;;  %s609_s2 = inlined_call_operand.hbm [shape: bf16[64,68], index: 2, kind: output, shape index: {}]  }
   0x1   :  { %9 = vsyncpa [#allocation3 + $0x1], 0  ;;  %s495_s9 = smov 0   ;;  %s497_s10 = smov 0  }
   0x2   :  { %s499_s11 = smov 0   ;;  %s501_s12 = smov 0  }
   0x3 LB: > { %s516_s13 = sadd.s32 4294967295, %s475_s12   ;;  %s329_s14 = sadd.s32 4294967294, %s475_s12   ;;  %s475_s12 = sphi %s501_s12, %s615_s12   ;;  %s471_s11 = sphi %s499_s11, %s614_s11   ;;  %s467_s10 = sphi %s497_s10, %s613_s10   ;;  %s463_s9 = sphi %s495_s9, %s612_s9  }
   0x4   : > { %s520_s15 = sadd.s32 1, %s475_s12   ;;  %s69_s16 = sadd.s32 1, %s471_s11 }
   0x5   : > { %s66_s17 = ssub.s32 %s475_s12, %s520_s15  ;;  %p79_p0 = scmp.ne.s32.totalorder %s471_s11, %s467_s10 }
   0x6   : > { %p67_p1 = scmp.eq.s32.totalorder %s66_s17, 0  ;;  %p80_p2 = scmp.eq.s32.totalorder %s516_s13, 1 }
   0x7   : > { %p85_p3 = scmp.ne.s32.totalorder %s467_s10, %s463_s9  ;;  %p86_p4 = scmp.eq.s32.totalorder %s329_s14, 1 }
   0x8   : > { %s531_s18 = scalar_select %p67_p1, %s471_s11, %s69_s16  }
   0x9   : > { %p533_p5 = por %p80_p2, %p79_p0  ;;  %p537_p6 = por %p86_p4, %p85_p3 }
   0xa   : > { %p332_p7 = scmp.ge.s32.totalorder %s475_s12, 1  ;;  %p116_p8 = scmp.lt.s32.totalorder %s475_s12, 3 }
   0xc   : > { %p117_p9 = pnand %p332_p7, %p116_p8 }
   0xd   : > { %v409_v0 = vld [vmem:[%s608_s1] sm:$0xff] (!%p117_p9)   ;;  %s334_s23 = sshll.u32 (!%p117_p9), %s516_s13, 2  ;;  %v410_v1 = vld [vmem:[%s608_s1 + $0x8] sm:$0xff] (!%p117_p9)   ;;  %vm176_vm0 = vcmask (!%p117_p9), 261120   ;;  %s135_s30 = sand.u32 (!%p117_p9), 1, %s467_s10   ;;  %vm248_vm1 = vcmask (!%p117_p9), 551936  }
   0xe   : > { %120 = sbr.rel (%p117_p9) target bundleno = 258 (0x102), region = 28  ;;  %p139_p10 = scmp.lt.s32.totalorder (!%p117_p9), %s334_s23, 7  ;;  %360 = vmatprep.subr.bf16.mxu0 (!%p117_p9), %v409_v0 }
   0xf   : > { %361 = vmatpush3.bf16.msra.mxu0 (!%p117_p9), %v409_v0  ;;  %s333_s3 = sshll.u32 (!%p117_p9), %s135_s30, 4  ;;  %s355_s6 = sshll.u32 (!%p117_p9), %s516_s13, 8 }
  0x10   : > { %362 = vmatprep.subr.bf16.mxu0 (!%p117_p9), %v410_v1  ;;  %s137_s4 = scalar_lea.vmem (!%p117_p9), [#allocation2], %s333_s3  ;;  %s561_s14 = scalar_lea.hbm (!%p117_p9), %s609_s2, %s355_s6 }
  0x11   : > { %s267_s5 = sshll.u32 (!%p117_p9), %s137_s4, 4  ;;  %s566_s13 = scalar_lea.sflag (!%p117_p9), [#allocation3], %s135_s30  ;;  %s556_s5 = int_to_ptr.vmem [resolvable:$true] %s267_s5 }
  0x12   : > { %s413_s16 = scalar_lea.vmem (!%p117_p9), %s556_s5, 256  ;;  %s477_s17 = smov (!%p117_p9), [#allocation2]  }
  0x13   : > { %363 = vmatpush3.bf16.msra.mxu0 (!%p117_p9), %v410_v1  ;;  %p414_p11 = scmp.ne.s32.totalorder (!%p117_p9), %s556_s5, %s413_s16  ;;  %s417_s21 = sshll.u32 (!%p117_p9), %s477_s17, 4  ;;  %s418_s21 = int_to_ptr.vmem [resolvable:$false] %s417_s21 }
  0x14   : > { %s419_s22 = scalar_lea.vmem (!%p117_p9), %s418_s21, 512  ;;  %p420_p0 = scmp.lt.s32.totalorder (!%p117_p9), %s556_s5, %s418_s21 }
  0x15   : > { %s617_s23 = smov (!%p139_p10, %s334_s23), 7  ;;  %p415_p12 = pnand %p414_p11, %p533_p5 }
  0x16   : > { %s335_s26 = sshll.u32 %s617_s23, 2  ;;  %p421_p1 = scmp.lt.s32.totalorder %s419_s22, %s413_s16 }
  0x17   : > { %s142_s29 = scalar_lea.vmem %s607_s0, %s335_s26  ;;  %p416_p13 = pneg %p415_p12 }
  0x18   : > { %v411_v2 = vld [vmem:[%s142_s29] sm:$0xff]   ;;  %v412_v3 = vld [vmem:[%s142_s29 + $0x8] sm:$0xff]   ;;  %p422_p2 = por %p421_p1, %p420_p0 }
  0x19   : > { %364 = vmatprep.mubr.msk.bf16.mxu0 %vm176_vm0, %v411_v2 }
  0x1a   : > { %365 = vmatmul.mubr.msk.bf16.vlgmr.msra.gmra.mrb[0].mxu0 %vm176_vm0, %v412_v3  ;;  %p423_p3 = pnand %p422_p2, %p416_p13 }
  0xed   : > { %v366_v4 = vpop.f32.mrb[0].mxu0 }
  0xee   : > { %v353_v5 = vpack.c.bf16 %v366_v4, %v366_v4  ;;  %v217_v6 = vpop.f32.mrb[1].mxu0 }
  0xef   : > { %v351_v7 = vpack.c.bf16 %v217_v6, %v217_v6  ;;  %v367_v8 = vpop.f32.mrb[2].mxu0 }
  0xf0   : > { %251 = vst.msk [vmem:[%s137_s4 + $0x8] sm:$0xf] %vm248_vm1, %v353_v5  ;;  %v354_v9 = vpack.c.bf16 %v367_v8, %v367_v8  ;;  %v220_v10 = vpop.f32.mrb[3].mxu0 }
  0xf1   : > { %249 = vst.msk [vmem:[%s137_s4] sm:$0xf] %vm248_vm1, %v351_v7  ;;  %v352_v11 = vpack.c.bf16 %v220_v10, %v220_v10 }
  0xf2   : > { %252 = vst.msk [vmem:[%s137_s4 + $0xc] sm:$0xf] %vm248_vm1, %v354_v9 }
  0xf3   : > { %250 = vst.msk [vmem:[%s137_s4 + $0x4] sm:$0xf] %vm248_vm1, %v352_v11 }
  0xf4   : > { %426 = shalt.err (!%p423_p3)
}
  0xf5   : > { %s427_s23 = scalar_lea.hbm %s561_s14, 256  ;;  %s431_s26 = scalar_lea.hbm %s609_s2, 512 }
  0xf6   : > { %p428_p4 = scmp.ne.s32.totalorder %s561_s14, %s427_s23  ;;  %p432_p9 = scmp.lt.u32.totalorder %s561_s14, %s609_s2 }
  0xf7   : > { %p433_p10 = scmp.lt.u32.totalorder %s431_s26, %s427_s23  ;;  %p435_p12 = scmp.lt.u32.totalorder %s427_s23, %s561_s14 }
  0xf8   : > { %p429_p7 = pnand %p428_p4, %p533_p5 }
  0xf9   : > { %p434_p11 = por %p433_p10, %p432_p9 }
  0xfa   : > { %p430_p8 = pneg %p429_p7 }
  0xfb   : > { %p436_p13 = por %p435_p12, %p434_p11 }
  0xfd   : > { %p437_p0 = pnand %p436_p13, %p430_p8 }
  0xff   : > { %440 = shalt.err (!%p437_p0)
}
 0x100   : > { %s478_s29 = smov 64   ;;  %s479_s30 = smov 4  }
 0x101   : > { %368 = dma.vmem_to_hbm [thread:$0]  (%p533_p5), %s556_s5, 256, %s561_s14, %s566_s13, %s478_s29, %s478_s29, %s479_s30  }
 0x102 PF: > { %p374_p1 = scmp.ge.s32.totalorder %s475_s12, 2  ;;  %s282_s3 = sand.u32 1, %s463_s9  }
 0x103   : > { %s283_s4 = scalar_lea.sflag [#allocation3], %s282_s3 }
 0x104   : > { %p371_p2 = pnand %p374_p1, %p537_p6 }
 0x106   : > { %458 = dma.done.wait (!%p371_p2), %s283_s4, 256  }
 0x107   : > { %460 = vsyncadd (!%p371_p2), %s283_s4, 4294967040  ;;  %p12_p3 = scmp.ge.s32.totalorder %s520_s15, 4   ;;  %s612_s9 = smov %s467_s10 }
 0x108   : > { %s613_s10 = smov %s471_s11  ;;  %s614_s11 = smov %s531_s18 }
 0x109   : > { %s615_s12 = smov %s520_s15  ;;  %14 = sbr.rel (!%p12_p3) target bundleno = 3 (0x3), region = 63 }
 0x110   :  { %288 = vsyncpa [#allocation3], 1 }
 0x111   :  { %290 = vsyncpa [#allocation3 + $0x1], 1 }

</bundles_post_ra>
